<compile_context>
chip_gen: v7x
topology: tpu7x:2x2x1
jax: 0.10.0
libtpu: 0.0.40
codegen_flags: <defaults>
</compile_context>

<pallas_src>
import jax
import jax.numpy as jnp
from jax.experimental import pallas as pl
from jax.experimental.pallas import tpu as pltpu

_LANES = 128
_WIDTH_CANDIDATES = (4096, 2048, 1024, 512, 256, 128)  # lane-dense widths
_RAGGED_MAX_BLOCK_ELEMS = 64 * 1024                     # modest blocks on the rare ragged path


def _relu_shift_kernel(alpha_ref, x_ref, o_ref):
    # alpha_ref: (1,) scalar in SMEM; x_ref / o_ref: VMEM tiles of the same block shape.
    a = alpha_ref[0]
    shifted = x_ref[...] - a
    # zero in the computation dtype: no accidental promotion for non-f32 inputs
    o_ref[...] = jnp.maximum(shifted, jnp.zeros_like(shifted)).astype(o_ref.dtype)


def _tpu_vmem_capacity_bytes():
    """Best-effort physical VMEM capacity; falls back to the v5e/v6e value."""
    try:
        info = pltpu.get_tpu_info()
        cap = getattr(info, "vmem_capacity_bytes", None)
        if cap:
            return int(cap)
    except Exception:
        pass
    return 128 * 1024 * 1024


def _round_up(v, m):
    return -(-v // m) * m


def _choose_block_rows(rows, width, itemsize, target_block_bytes):
    """Sublane-aligned row block targeting ~target_block_bytes, >=4 grid steps, even count."""
    sub = 8 * max(1, 4 // itemsize)  # sublane multiple: 8 (f32), 16 (bf16), 32 (int8)
    if rows <= sub:
        return rows  # full first dim is always a legal block shape

    br = max(sub, (target_block_bytes // (width * itemsize)) // sub * sub)

    # Keep >= 4 grid steps (2 per v7x TensorCore) when the array allows it,
    # otherwise at least 2 steps, so each core gets pipelined prefetch/writeback.
    if rows >= 4 * sub:
        br = min(br, _round_up(-(-rows // 4), sub))
    else:
        br = min(br, _round_up(-(-rows // 2), sub))
    br = min(br, _round_up(rows, sub))

    # Prefer an even number of grid steps for a balanced 2-TC split.
    steps = -(-rows // br)
    if steps > 1 and steps % 2 == 1:
        br_alt = max(sub, _round_up(-(-rows // (steps + 1)), sub))
        if (-(-rows // br_alt)) % 2 == 0:
            br = br_alt
    return br


def _choose_ragged_block_width(n):
    """Block width for the rare (1, n) ragged layout (n not a multiple of 128)."""
    if n <= _RAGGED_MAX_BLOCK_ELEMS:
        return n  # full-dim block (always legal)
    return _RAGGED_MAX_BLOCK_ELEMS  # multiple of 128; partial last block is masked


def relu_shift(x, alpha):
    """Elementwise relu(x - alpha). x: any shape; alpha: scalar (trainable) parameter."""
    orig_shape = x.shape
    dtype = x.dtype
    n = x.size
    if n == 0:
        return x

    itemsize = jnp.dtype(dtype).itemsize
    flat = x.reshape(-1)
    alpha_smem = jnp.asarray(alpha, dtype=dtype).reshape(1)

    # Generation-aware budgets (v7x: 64 MiB VMEM -> 48 MiB limit; v5e/v6e: 128 MiB -> 64 MiB).
    vmem_cap = _tpu_vmem_capacity_bytes()
    if vmem_cap <= 64 * 1024 * 1024:
        target_block_bytes = 8 * 1024 * 1024
        vmem_limit_bytes = 48 * 1024 * 1024
    else:
        target_block_bytes = 8 * 1024 * 1024
        vmem_limit_bytes = 64 * 1024 * 1024

    width = next((w for w in _WIDTH_CANDIDATES if n % w == 0), None)
    if width is not None:
        # Fast path: lane-dense (rows, width) view, zero-copy reshape.
        rows = n // width
        x2d = flat.reshape(rows, width)
        block_rows = _choose_block_rows(rows, width, itemsize, target_block_bytes)
        grid = (pl.cdiv(rows, block_rows),)
        block = (block_rows, width)
        index_map = lambda i: (i, 0)
    else:
        # Ragged path (size not a multiple of 128): single-row view, no pad / no slice;
        # Pallas masks the partial last block.
        x2d = flat.reshape(1, n)
        block_w = _choose_ragged_block_width(n)
        grid = (pl.cdiv(n, block_w),)
        block = (1, block_w)
        index_map = lambda i: (0, i)

    out2d = pl.pallas_call(
        _relu_shift_kernel,
        out_shape=jax.ShapeDtypeStruct(x2d.shape, dtype),
        grid_spec=pltpu.PrefetchScalarGridSpec(
            num_scalar_prefetch=0,
            grid=grid,
            in_specs=[
                pl.BlockSpec(memory_space=pltpu.MemorySpace.SMEM),
                pl.BlockSpec(block, index_map),
            ],
            out_specs=pl.BlockSpec(block, index_map),
        ),
        compiler_params=pltpu.CompilerParams(
            dimension_semantics=("parallel",),
            vmem_limit_bytes=vmem_limit_bytes,
        ),
        cost_estimate=pl.CostEstimate(
            flops=2 * n,
            transcendentals=0,
            bytes_accessed=2 * n * itemsize,
        ),
    )(alpha_smem, x2d)

    return out2d.reshape(orig_shape)


if __name__ == "__main__":
    key = jax.random.PRNGKey(0)
    k1, k2, k3 = jax.random.split(key, 3)
    alpha = jnp.float32(0.1)

    # 1) Input shape consistent with (N, *): (N=2, C=4, H=16, W=16), 128-divisible fast path.
    x = jax.random.normal(k1, (2, 4, 16, 16), dtype=jnp.float32)
    y = jax.block_until_ready(relu_shift(x, alpha))
    y_ref = jnp.maximum(x - alpha, 0.0)
    assert y.shape == x.shape and y.dtype == x.dtype
    assert jnp.allclose(y, y_ref, atol=1e-6, rtol=1e-6)

    # 2) Ragged (non-128-divisible) path: handled with a (1, n) view, no pad / slice passes.
    x2 = jax.random.normal(k2, (3, 5, 7), dtype=jnp.float32)
    y2 = jax.block_until_ready(relu_shift(x2, alpha))
    y2_ref = jnp.maximum(x2 - alpha, 0.0)
    assert y2.shape == x2.shape and jnp.allclose(y2, y2_ref, atol=1e-6, rtol=1e-6)

    # 3) Multi-step grid with a partial last row block (rows=9, block_rows=8).
    x3 = jax.random.normal(k3, (9, 4, 16, 32), dtype=jnp.float32)
    y3 = jax.block_until_ready(relu_shift(x3, alpha))
    y3_ref = jnp.maximum(x3 - alpha, 0.0)
    assert y3.shape == x3.shape and jnp.allclose(y3, y3_ref, atol=1e-6, rtol=1e-6)

    print("KERNEL_OK")
</pallas_src>

<mosaic_0001>
module attributes {stable_mosaic.version = 11 : i64} {
  func.func @_relu_shift_kernel(%arg0: i32, %arg1: memref<1xf32, #tpu.memory_space<smem>>, %arg2: memref<1x2048xf32, #tpu.memory_space<vmem>>, %arg3: memref<1x2048xf32, #tpu.memory_space<vmem>>) attributes {dimension_semantics = [#tpu.dimension_semantics<parallel>], iteration_bounds = array<i64: 1>, scalar_prefetch = 0 : i64, scratch_operands = 0 : i64, tpu.core_type = #tpu.core_type<tc>, window_params = [{transform_indices = @transform_0, window_bounds = array<i64: 1>}, {transform_indices = @transform_1, window_bounds = array<i64: 1, 2048>}, {transform_indices = @transform_2, window_bounds = array<i64: 1, 2048>}]} {
    %c0 = arith.constant 0 : index
    %0 = memref.load %arg1[%c0] : memref<1xf32, #tpu.memory_space<smem>>
    %c0_0 = arith.constant 0 : index
    %c0_1 = arith.constant 0 : index
    %1 = vector.load %arg2[%c0_0, %c0_1] : memref<1x2048xf32, #tpu.memory_space<vmem>>, vector<1x2048xf32>
    %2 = vector.broadcast %0 : f32 to vector<1x2048xf32>
    %3 = arith.subf %1, %2 : vector<1x2048xf32>
    %cst = arith.constant 0.000000e+00 : f32
    %4 = vector.broadcast %cst : f32 to vector<1x2048xf32>
    %5 = arith.maximumf %3, %4 : vector<1x2048xf32>
    %c0_2 = arith.constant 0 : index
    %c0_3 = arith.constant 0 : index
    %6 = vector.load %arg3[%c0_2, %c0_3] : memref<1x2048xf32, #tpu.memory_space<vmem>>, vector<1x2048xf32>
    tpu.vector_store %arg3[%c0_2, %c0_3], %5 {strides = array<i32>} : memref<1x2048xf32, #tpu.memory_space<vmem>>, vector<1x2048xf32>,
    return
  }
  func.func @transform_0(%arg0: i32) -> i32 {
    %c0_i32 = arith.constant 0 : i32
    %c0_i32_0 = arith.constant 0 : i32
    return %c0_i32 : i32
  }
  func.func @transform_1(%arg0: i32) -> (i32, i32) {
    %c0_i32 = arith.constant 0 : i32
    %c0_i32_0 = arith.constant 0 : i32
    return %arg0, %c0_i32 : i32, i32
  }
  func.func @transform_2(%arg0: i32) -> (i32, i32) {
    %c0_i32 = arith.constant 0 : i32
    %c0_i32_0 = arith.constant 0 : i32
    return %arg0, %c0_i32 : i32, i32
  }
}

</mosaic_0001>

<bundles_post_ra>
// kernel: tpu_custom_call.1
= control target key start
LH: loop header
LB: loop body
LE: loop exit
PB: predicated region body
PF: predicated region fallthrough
CT: control target
= control target key end

     0   :  { %8 = vsyncpa [#allocation4], 0  ;;  %s144_s0 = inlined_call_operand.<no memory space> [shape: f32[1], index: 0, kind: input, shape index: {}]   ;;  %s145_s1 = inlined_call_operand.hbm [shape: f32[1,2048], index: 1, kind: input, shape index: {}]   ;;  %s146_s2 = inlined_call_operand.hbm [shape: f32[1,2048], index: 2, kind: output, shape index: {}]  }
   0x1   :  { %9 = vsyncpa [#allocation5], 0  ;;  %s100_s9 = smov [#allocation3]   ;;  %s52_s13 = scalar_lea.hbm %s145_s1, 256 }
   0x2   :  { %s18_s10 = sshll.u32 %s100_s9, 4  ;;  %p53_p0 = scmp.ne.s32.totalorder %s145_s1, %s52_s13  ;;  %s19_s10 = int_to_ptr.vmem [resolvable:$true] %s18_s10 }
   0x3   :  { %p56_p1 = scmp.lt.u32.totalorder %s52_s13, %s145_s1 }
   0x5   :  { %p58_p2 = pnand %p56_p1, %p53_p0 }
   0x7   :  { %61 = shalt.err (!%p58_p2)
}
   0x8   :  { %s62_s18 = scalar_lea.vmem %s19_s10, 256  ;;  %p67_p4 = scmp.lt.s32.totalorder %s19_s10, %s19_s10 }
   0x9   :  { %p63_p3 = scmp.ne.s32.totalorder %s19_s10, %s62_s18  ;;  %p68_p5 = scmp.lt.s32.totalorder %s62_s18, %s62_s18 }
   0xb   :  { %p69_p6 = por %p68_p5, %p67_p4 }
   0xd   :  { %p70_p7 = pnand %p69_p6, %p63_p3 }
   0xf   :  { %73 = shalt.err (!%p70_p7)
}
  0x10   :  { %21 = dma.hbm_to_vmem [thread:$0]  %s145_s1, 256, %s19_s10, [#allocation4]  }
  0x11   :  { %96 = dma.done.wait [#allocation4], 256  }
  0x12   :  { %97 = vsyncadd [#allocation4], 4294967040  ;;  %v28_v0 = vstv %s144_s0  ;;  %v26_v1 = vld [vmem:[#allocation3] sm:$0xff]  ;;  %v27_v2 = vld [vmem:[#allocation3 + $0x8] sm:$0xff]  ;;  %s101_s23 = smov [#allocation6]  }
  0x13   :  { %s41_s24 = sshll.u32 %s101_s23, 4  ;;  %v29_v3 = vsub.f32 %v26_v1, %v28_v0  ;;  %v30_v4 = vsub.f32 %v27_v2, %v28_v0  ;;  %s42_s24 = int_to_ptr.vmem [resolvable:$true] %s41_s24 }
  0x14   :  { %s74_s25 = scalar_lea.vmem %s42_s24, 256  ;;  %p79_p9 = scmp.lt.s32.totalorder %s42_s24, %s42_s24 }
  0x15   :  { %v31_v5 = vmax.f32 %v29_v3, 0.0  ;;  %v32_v6 = vmax.f32 %v30_v4, 0.0  ;;  %p75_p8 = scmp.ne.s32.totalorder %s42_s24, %s74_s25  ;;  %p80_p10 = scmp.lt.s32.totalorder %s74_s25, %s74_s25 }
  0x17   :  { %33 = vst [vmem:[#allocation6] sm:$0xff] %v31_v5  ;;  %34 = vst [vmem:[#allocation6 + $0x8] sm:$0xff] %v32_v6  ;;  %p81_p11 = por %p80_p10, %p79_p9 }
  0x19   :  { %p82_p12 = pnand %p81_p11, %p75_p8 }
  0x1b   :  { %85 = shalt.err (!%p82_p12)
}
  0x1c   :  { %s86_s26 = scalar_lea.hbm %s146_s2, 256 }
  0x1d   :  { %p87_p13 = scmp.ne.s32.totalorder %s146_s2, %s86_s26  ;;  %p90_p0 = scmp.lt.u32.totalorder %s86_s26, %s146_s2 }
  0x1f   :  { %p92_p1 = pnand %p90_p0, %p87_p13 }
  0x21   :  { %95 = shalt.err (!%p92_p1)
}
  0x22   :  { %44 = dma.vmem_to_hbm [thread:$0]  %s42_s24, 256, %s146_s2, [#allocation5]  }
  0x23   :  { %98 = dma.done.wait [#allocation5], 256  }
  0x24   :  { %99 = vsyncadd [#allocation5], 4294967040 }
  0x25   :  { %48 = vsyncpa [#allocation4], 1 }
  0x26   :  { %49 = vsyncpa [#allocation5], 1 }

</bundles_post_ra>
